<compile_context>
chip_gen: v7x
topology: tpu7x:2x2x1
jax: 0.10.0
libtpu: 0.0.40
codegen_flags: <defaults>
</compile_context>

<pallas_src>
import jax
import jax.numpy as jnp
import numpy as np
from jax.experimental import pallas as pl
from jax.experimental.pallas import tpu as pltpu


def _center_loss_kernel(x_ref, l_ref, ct_ref, csq_ref, cls_ref, out_ref):
    """Grid = (num_cores, steps_per_core); one step handles a (tm, D) row tile.

    x_ref  : (tm, D)    f32  features (rows past N are zero; their label 0 never matches)
    l_ref  : (tm, 1)    i32  labels
    ct_ref : (D, CP)    f32  centers.T, zero-padded past C (grid-invariant, VMEM-resident)
    csq_ref: (1, CP)    f32  per-center squared norms, zero-padded (grid-invariant)
    cls_ref: (1, CP)    i32  class ids 1..C, padded with -1 so lane padding never matches
    out_ref: (1, 8, CP) f32  per-core accumulator of clamped matched distances
    """
    i = pl.program_id(1)

    @pl.when(i == 0)
    def _():
        out_ref[...] = jnp.zeros_like(out_ref)

    x = x_ref[...]                                                     # (tm, D)
    x_sq = jnp.sum(x * x, axis=1, keepdims=True)                       # (tm, 1)
    xc = jnp.dot(x, ct_ref[...], preferred_element_type=jnp.float32)   # MXU, (tm, CP)
    distmat = x_sq + csq_ref[...] - 2.0 * xc                           # squared distances

    # Label preprocessing (matches the module): 0 -> ignore(255) -> 0; 0 never matches 1..C.
    l = l_ref[...]                                                      # (tm, 1) i32
    l = jnp.where(l == 0, 255, l)
    l = jnp.where(l == 255, 0, l)
    mask = l == cls_ref[...]                                            # (tm, CP) bool

    # Matched entries contribute clamp(dist, 1e-12, 1e12); unmatched contribute 0 here —
    # their 1e-12 clamp floor is added analytically in the wrapper.
    contrib = jnp.where(mask, jnp.clip(distmat, 1e-12, 1e12), 0.0)

    # Accumulate-then-reduce: fold tm rows -> 8 sublanes with plain cross-vreg VALU adds;
    # the final cross-lane reduction happens once, in the wrapper.
    tm, cp = contrib.shape
    partial = contrib.reshape(tm // 8, 8, cp).sum(axis=0)               # (8, CP)
    out_ref[...] += partial[None, :, :]


def center_loss_pallas(x, labels, centers, loss_weight=1.0, tm=512, num_cores=2):
    """CenterLoss forward. x: (B, feat_dim, H, W); labels: (B, H, W) int; centers: (C, feat_dim)."""
    B, D, H, W = x.shape
    C = centers.shape[0]
    CP = 128  # lane-pad only the tiny, grid-invariant class axis (free: stays in VMEM)

    # Glue: NCHW -> NHWC -> (N, D), exactly like the PyTorch permute+view.
    x_flat = jnp.transpose(x, (0, 2, 3, 1)).reshape(-1, D).astype(jnp.float32)
    l_flat = labels.reshape(-1).astype(jnp.int32)
    N = x_flat.shape[0]

    # Denominator (mask.sum()) and the clamp-floor of unmatched entries depend only on
    # labels -> trivial wrapper reductions, removed from the hot loop entirely.
    l_eff = jnp.where(l_flat == 0, 255, l_flat)
    l_eff = jnp.where(l_eff == 255, 0, l_eff)
    mask_cnt = jnp.sum(((l_eff >= 1) & (l_eff <= C)).astype(jnp.float32))
    floor_sum = jnp.float32(1e-12) * (jnp.float32(N * C) - mask_cnt)

    # Row tiling: large tiles amortize the ~600-cycle per-step overhead, but never over-pad
    # small inputs. num_cores splits rows across TensorCores (v7x); harmless on 1-TC chips.
    rows_per_core = pl.cdiv(N, num_cores)
    tm = max(8, min(tm, pl.cdiv(rows_per_core, 8) * 8))
    steps_per_core = pl.cdiv(rows_per_core, tm)
    n_pad = num_cores * steps_per_core * tm

    # Pad only the row count; feature dim stays at D (no 32x HBM traffic inflation).
    x_pad = jnp.zeros((n_pad, D), jnp.float32).at[:N].set(x_flat)
    l_pad = jnp.zeros((n_pad, 1), jnp.int32).at[:N, 0].set(l_flat)   # pad label 0 -> no match

    centers_f32 = centers.astype(jnp.float32)
    ct_pad = jnp.zeros((D, CP), jnp.float32).at[:, :C].set(centers_f32.T)
    csq_pad = jnp.zeros((1, CP), jnp.float32).at[0, :C].set(jnp.sum(centers_f32 ** 2, axis=1))
    cls_pad = jnp.full((1, CP), -1, jnp.int32).at[0, :C].set(
        jnp.arange(1, C + 1, dtype=jnp.int32))

    row_map = lambda c, i: (c * steps_per_core + i, 0)
    const_map = lambda c, i: (0, 0)

    partials = pl.pallas_call(
        _center_loss_kernel,
        out_shape=jax.ShapeDtypeStruct((num_cores, 8, CP), jnp.float32),
        grid_spec=pltpu.PrefetchScalarGridSpec(
            num_scalar_prefetch=0,
            grid=(num_cores, steps_per_core),
            in_specs=[
                pl.BlockSpec((tm, D), row_map),      # streamed features
                pl.BlockSpec((tm, 1), row_map),      # streamed labels
                pl.BlockSpec((D, CP), const_map),    # centers.T  (resident)
                pl.BlockSpec((1, CP), const_map),    # ||c||^2    (resident)
                pl.BlockSpec((1, CP), const_map),    # class ids  (resident)
            ],
            out_specs=pl.BlockSpec((1, 8, CP), lambda c, i: (c, 0, 0)),
        ),
        compiler_params=pltpu.CompilerParams(
            dimension_semantics=("parallel", "arbitrary")),
    )(x_pad, l_pad, ct_pad, csq_pad, cls_pad)

    matched_sum = jnp.sum(partials)
    # NOTE: division is unguarded when no label falls in [1, C] (inf/NaN), same as PyTorch.
    return loss_weight * (matched_sum + floor_sum) / mask_cnt


def center_loss_ref(x, labels, centers, loss_weight=1.0):
    """Pure-JAX reference mirroring the PyTorch forward (for correctness check)."""
    B, D, H, W = x.shape
    C = centers.shape[0]
    xf = jnp.transpose(x, (0, 2, 3, 1)).reshape(-1, D).astype(jnp.float32)
    cf = centers.astype(jnp.float32)
    distmat = (jnp.sum(xf ** 2, axis=1, keepdims=True)
               + jnp.sum(cf ** 2, axis=1)[None, :]
               - 2.0 * xf @ cf.T)
    classes = jnp.arange(C, dtype=jnp.int32) + 1
    l = labels.reshape(-1, 1).astype(jnp.int32)
    l = jnp.where(l == 0, 255, l)
    l = l * (l != 255).astype(jnp.int32)
    mask = l == classes[None, :]
    dist = distmat * mask.astype(jnp.float32)
    loss = jnp.clip(dist, 1e-12, 1e12).sum() / mask.sum()
    return loss_weight * loss


if __name__ == "__main__":
    # Module defaults: num_classes=4 -> effective 3 centers, feat_dim=4.
    NUM_CLASSES_ARG = 4
    FEAT_DIM = 4
    EFF_CLASSES = NUM_CLASSES_ARG - 1
    LOSS_WEIGHT = 1.0

    B, H, W = 2, 16, 16

    key = jax.random.PRNGKey(0)
    kx, kl, kc = jax.random.split(key, 3)

    x = jax.random.normal(kx, (B, FEAT_DIM, H, W), dtype=jnp.float32)
    # labels in {0,...,4}: 0 is ignored, 1..3 match centers, 4 never matches; add some 255s.
    labels = jax.random.randint(kl, (B, H, W), 0, 5, dtype=jnp.int32)
    labels = labels.at[0, 0, :4].set(255)
    # deterministic stand-in for nn.Parameter(torch.randn(num_classes-1, feat_dim))
    centers = jax.random.normal(kc, (EFF_CLASSES, FEAT_DIM), dtype=jnp.float32)

    loss = jax.block_until_ready(
        center_loss_pallas(x, labels, centers, loss_weight=LOSS_WEIGHT))
    ref = jax.block_until_ready(
        center_loss_ref(x, labels, centers, loss_weight=LOSS_WEIGHT))
    np.testing.assert_allclose(np.asarray(loss), np.asarray(ref), rtol=1e-5, atol=1e-5)

    print("KERNEL_OK")
</pallas_src>

<mosaic_0001>
module attributes {stable_mosaic.version = 11 : i64} {
  func.func @_center_loss_kernel(%arg0: i32, %arg1: i32, %arg2: memref<256x4xf32, #tpu.memory_space<vmem>>, %arg3: memref<256x1xi32, #tpu.memory_space<vmem>>, %arg4: memref<4x128xf32, #tpu.memory_space<vmem>>, %arg5: memref<1x128xf32, #tpu.memory_space<vmem>>, %arg6: memref<1x128xi32, #tpu.memory_space<vmem>>, %arg7: memref<1x8x128xf32, #tpu.memory_space<vmem>>) attributes {dimension_semantics = [#tpu.dimension_semantics<parallel>, #tpu.dimension_semantics<arbitrary>], iteration_bounds = array<i64: 2, 1>, scalar_prefetch = 0 : i64, scratch_operands = 0 : i64, tpu.core_type = #tpu.core_type<tc>, window_params = [{transform_indices = @transform_0, window_bounds = array<i64: 256, 4>}, {transform_indices = @transform_1, window_bounds = array<i64: 256, 1>}, {pipeline_mode = #tpu.pipeline_mode<synchronous>, transform_indices = @transform_2, window_bounds = array<i64: 4, 128>}, {pipeline_mode = #tpu.pipeline_mode<synchronous>, transform_indices = @transform_3, window_bounds = array<i64: 1, 128>}, {pipeline_mode = #tpu.pipeline_mode<synchronous>, transform_indices = @transform_4, window_bounds = array<i64: 1, 128>}, {transform_indices = @transform_5, window_bounds = array<i64: 1, 8, 128>}]} {
    %c0_i32 = arith.constant 0 : i32
    %0 = arith.cmpi eq, %arg1, %c0_i32 : i32
    %1 = arith.extui %0 : i1 to i32
    %c0_i32_0 = arith.constant 0 : i32
    %2 = arith.cmpi ne, %1, %c0_i32_0 : i32
    scf.if %2 {
      %cst_25 = arith.constant 0.000000e+00 : f32
      %41 = vector.broadcast %cst_25 : f32 to vector<1x8x128xf32>
      %c0_26 = arith.constant 0 : index
      %c0_27 = arith.constant 0 : index
      %c0_28 = arith.constant 0 : index
      %42 = vector.load %arg7[%c0_26, %c0_27, %c0_28] : memref<1x8x128xf32, #tpu.memory_space<vmem>>, vector<1x8x128xf32>
      tpu.vector_store %arg7[%c0_26, %c0_27, %c0_28], %41 {strides = array<i32>} : memref<1x8x128xf32, #tpu.memory_space<vmem>>, vector<1x8x128xf32>,
    } else {
    }
    %c0 = arith.constant 0 : index
    %c0_1 = arith.constant 0 : index
    %3 = vector.load %arg2[%c0, %c0_1] : memref<256x4xf32, #tpu.memory_space<vmem>>, vector<256x4xf32>
    %4 = arith.mulf %3, %3 : vector<256x4xf32>
    %cst = arith.constant dense<0.000000e+00> : vector<256xf32>
    %5 = vector.multi_reduction <add>, %4, %cst [1] : vector<256x4xf32> to vector<256xf32>
    %6 = vector.shape_cast %5 : vector<256xf32> to vector<256x1xf32>
    %c0_2 = arith.constant 0 : index
    %c0_3 = arith.constant 0 : index
    %7 = vector.load %arg4[%c0_2, %c0_3] : memref<4x128xf32, #tpu.memory_space<vmem>>, vector<4x128xf32>
    %cst_4 = arith.constant dense<0.000000e+00> : vector<256x128xf32>
    %8 = tpu.matmul %3, %7, %cst_4 {dimension_numbers = #tpu.dot_dimension_numbers<[1], [0], [0], [1], [0, 0, 1, 1], [], []>} : vector<256x4xf32>, vector<4x128xf32>, vector<256x128xf32> -> vector<256x128xf32>
    %c0_5 = arith.constant 0 : index
    %c0_6 = arith.constant 0 : index
    %9 = vector.load %arg5[%c0_5, %c0_6] : memref<1x128xf32, #tpu.memory_space<vmem>>, vector<1x128xf32>
    %10 = vector.broadcast %6 : vector<256x1xf32> to vector<256x128xf32>
    %11 = vector.broadcast %9 : vector<1x128xf32> to vector<256x128xf32>
    %12 = arith.addf %10, %11 : vector<256x128xf32>
    %cst_7 = arith.constant 2.000000e+00 : f32
    %13 = vector.broadcast %cst_7 : f32 to vector<256x128xf32>
    %14 = arith.mulf %13, %8 : vector<256x128xf32>
    %15 = arith.subf %12, %14 : vector<256x128xf32>
    %c0_8 = arith.constant 0 : index
    %c0_9 = arith.constant 0 : index
    %16 = vector.load %arg3[%c0_8, %c0_9] : memref<256x1xi32, #tpu.memory_space<vmem>>, vector<256x1xi32>
    %c0_i32_10 = arith.constant 0 : i32
    %17 = vector.broadcast %c0_i32_10 : i32 to vector<256x1xi32>
    %18 = arith.cmpi eq, %16, %17 : vector<256x1xi32>
    %c255_i32 = arith.constant 255 : i32
    %19 = vector.broadcast %c255_i32 : i32 to vector<256x1xi32>
    %20 = arith.select %18, %19, %16 : vector<256x1xi1>, vector<256x1xi32>
    %c255_i32_11 = arith.constant 255 : i32
    %21 = vector.broadcast %c255_i32_11 : i32 to vector<256x1xi32>
    %22 = arith.cmpi eq, %20, %21 : vector<256x1xi32>
    %c0_i32_12 = arith.constant 0 : i32
    %23 = vector.broadcast %c0_i32_12 : i32 to vector<256x1xi32>
    %24 = arith.select %22, %23, %20 : vector<256x1xi1>, vector<256x1xi32>
    %c0_13 = arith.constant 0 : index
    %c0_14 = arith.constant 0 : index
    %25 = vector.load %arg6[%c0_13, %c0_14] : memref<1x128xi32, #tpu.memory_space<vmem>>, vector<1x128xi32>
    %26 = vector.broadcast %24 : vector<256x1xi32> to vector<256x128xi32>
    %27 = vector.broadcast %25 : vector<1x128xi32> to vector<256x128xi32>
    %28 = arith.cmpi eq, %26, %27 : vector<256x128xi32>
    %cst_15 = arith.constant 9.99999996E-13 : f32
    %cst_16 = arith.constant 9.99999995E+11 : f32
    %29 = vector.broadcast %cst_15 : f32 to vector<256x128xf32>
    %30 = arith.maximumf %29, %15 : vector<256x128xf32>
    %31 = vector.broadcast %cst_16 : f32 to vector<256x128xf32>
    %32 = arith.minimumf %31, %30 : vector<256x128xf32>
    %cst_17 = arith.constant 0.000000e+00 : f32
    %33 = vector.broadcast %cst_17 : f32 to vector<256x128xf32>
    %34 = arith.select %28, %32, %33 : vector<256x128xi1>, vector<256x128xf32>
    %35 = vector.shape_cast %34 : vector<256x128xf32> to vector<32x8x128xf32>
    %cst_18 = arith.constant dense<0.000000e+00> : vector<8x128xf32>
    %36 = vector.multi_reduction <add>, %35, %cst_18 [0] : vector<32x8x128xf32> to vector<8x128xf32>
    %c0_19 = arith.constant 0 : index
    %c0_20 = arith.constant 0 : index
    %c0_21 = arith.constant 0 : index
    %37 = vector.load %arg7[%c0_19, %c0_20, %c0_21] : memref<1x8x128xf32, #tpu.memory_space<vmem>>, vector<1x8x128xf32>
    %38 = vector.shape_cast %36 : vector<8x128xf32> to vector<1x8x128xf32>
    %39 = arith.addf %37, %38 : vector<1x8x128xf32>
    %c0_22 = arith.constant 0 : index
    %c0_23 = arith.constant 0 : index
    %c0_24 = arith.constant 0 : index
    %40 = vector.load %arg7[%c0_22, %c0_23, %c0_24] : memref<1x8x128xf32, #tpu.memory_space<vmem>>, vector<1x8x128xf32>
    tpu.vector_store %arg7[%c0_22, %c0_23, %c0_24], %39 {strides = array<i32>} : memref<1x8x128xf32, #tpu.memory_space<vmem>>, vector<1x8x128xf32>,
    return
  }
  func.func @transform_0(%arg0: i32, %arg1: i32) -> (i32, i32) {
    %c1_i32 = arith.constant 1 : i32
    %0 = arith.muli %arg0, %c1_i32 : i32
    %1 = arith.addi %0, %arg1 : i32
    %c0_i32 = arith.constant 0 : i32
    %c0_i32_0 = arith.constant 0 : i32
    return %1, %c0_i32 : i32, i32
  }
  func.func @transform_1(%arg0: i32, %arg1: i32) -> (i32, i32) {
    %c1_i32 = arith.constant 1 : i32
    %0 = arith.muli %arg0, %c1_i32 : i32
    %1 = arith.addi %0, %arg1 : i32
    %c0_i32 = arith.constant 0 : i32
    %c0_i32_0 = arith.constant 0 : i32
    return %1, %c0_i32 : i32, i32
  }
  func.func @transform_2(%arg0: i32, %arg1: i32) -> (i32, i32) {
    %c0_i32 = arith.constant 0 : i32
    %c0_i32_0 = arith.constant 0 : i32
    %c0_i32_1 = arith.constant 0 : i32
    return %c0_i32, %c0_i32_0 : i32, i32
  }
  func.func @transform_3(%arg0: i32, %arg1: i32) -> (i32, i32) {
    %c0_i32 = arith.constant 0 : i32
    %c0_i32_0 = arith.constant 0 : i32
    %c0_i32_1 = arith.constant 0 : i32
    return %c0_i32, %c0_i32_0 : i32, i32
  }
  func.func @transform_4(%arg0: i32, %arg1: i32) -> (i32, i32) {
    %c0_i32 = arith.constant 0 : i32
    %c0_i32_0 = arith.constant 0 : i32
    %c0_i32_1 = arith.constant 0 : i32
    return %c0_i32, %c0_i32_0 : i32, i32
  }
  func.func @transform_5(%arg0: i32, %arg1: i32) -> (i32, i32, i32) {
    %c0_i32 = arith.constant 0 : i32
    %c0_i32_0 = arith.constant 0 : i32
    %c0_i32_1 = arith.constant 0 : i32
    return %arg0, %c0_i32, %c0_i32_0 : i32, i32, i32
  }
}

</mosaic_0001>

<bundles_post_ra>
// kernel: tpu_custom_call.1
= control target key start
LH: loop header
LB: loop body
LE: loop exit
PB: predicated region body
PF: predicated region fallthrough
CT: control target
= control target key end

     0   :  { %10 = vsyncpa [#allocation3], 0  ;;  %s2280_s0 = inlined_call_operand.vmem [shape: f32[512,4], index: 0, kind: input, shape index: {}]   ;;  %s2281_s1 = inlined_call_operand.vmem [shape: s32[512,1], index: 1, kind: input, shape index: {}]   ;;  %s2282_s2 = inlined_call_operand.vmem [shape: f32[4,128], index: 2, kind: input, shape index: {}]   ;;  %s2283_s3 = inlined_call_operand.vmem [shape: f32[1,128], index: 3, kind: input, shape index: {}]   ;;  %s2284_s4 = inlined_call_operand.vmem [shape: s32[1,128], index: 4, kind: input, shape index: {}]   ;;  %s2285_s5 = inlined_call_operand.hbm [shape: f32[2,8,128], index: 5, kind: output, shape index: {}]  }
   0x1   :  { %12 = vsyncpa [#allocation3 + $0x1], 0  ;;  %s1689_s18 = smov 0   ;;  %s1691_s19 = smov 0  }
   0x2   :  { %s1693_s20 = smov 0   ;;  %s1695_s21 = smov 0  }
   0x3   :  { %s1697_s22 = smov 0   ;;  %s1699_s23 = smov 0  }
   0x4 LB: > { %s1384_s24 = sadd.s32 4294967295, %s1655_s23   ;;  %s1385_s25 = sadd.s32 4294967294, %s1655_s23   ;;  %s1655_s23 = sphi %s1699_s23, %s18_s23   ;;  %s1651_s22 = sphi %s1697_s22, %s2308_s22   ;;  %s1647_s21 = sphi %s1695_s21, %s2307_s21   ;;  %s1643_s20 = sphi %s1693_s20, %s2306_s20   ;;  %s1639_s19 = sphi %s1691_s19, %s2305_s19   ;;  %s1635_s18 = sphi %s1689_s18, %s2304_s18  }
   0x5   : > { %s30_s26 = sadd.s32 1, %s1651_s22  ;;  %s156_s27 = sadd.s32 1, %s1643_s20 }
   0x6   : > { %p32_p0 = scmp.ge.s32.totalorder %s30_s26, 2  ;;  %p166_p1 = scmp.ne.s32.totalorder %s1643_s20, %s1639_s19 }
   0x7   : > { %p167_p2 = scmp.eq.s32.totalorder %s1384_s24, 1  ;;  %p172_p3 = scmp.ne.s32.totalorder %s1639_s19, %s1635_s18 }
   0x8   : > { %s2310_s26 = smov (%p32_p0, %s30_s26), 0  ;;  %p173_p5 = scmp.eq.s32.totalorder %s1385_s25, 1 }
   0x9   : > { %p1729_p4 = por %p167_p2, %p166_p1  ;;  %s153_s29 = ssub.s32 %s1651_s22, %s2310_s26 }
   0xa   : > { %p1388_p6 = scmp.ge.s32.totalorder %s1655_s23, 1  ;;  %p154_p7 = scmp.eq.s32.totalorder %s153_s29, 0 }
   0xb   : > { %p1736_p8 = por %p173_p5, %p172_p3  ;;  %p222_p9 = scmp.lt.s32.totalorder %s1655_s23, 3 }
   0xc   : > { %s1742_s6 = scalar_select %p154_p7, %s1643_s20, %s156_s27  }
   0xd   : > { %p223_p10 = pnand %p1388_p6, %p222_p9 }
   0xf   : > { %226 = sbr.rel (%p223_p10) target bundleno = 334 (0x14e), region = 40 }
  0x16   : > { %v439_v0 = vld [vmem:[%s2282_s2] sm:$0xf]  ;;  %vm536_vm0 = vcmask 1043456   ;;  %s1390_s9 = sshll.u32 %s1647_s21, 5  ;;  %v1657_v1 = vmov 0   ;;  %vm342_vm1 = vcmask 31744  }
  0x17   : > { %1466 = vmatprep.subr.msk.mxu0 %vm536_vm0, %v439_v0  ;;  %1516 = vmatprep.subr.msk.mxu1 %vm536_vm0, %v439_v0  ;;  %p259_p11 = scmp.lt.s32.totalorder %s1390_s9, 63  ;;  %s254_s29 = sand.u32 1, %s1639_s19  }
  0x18   : > { %1467 = vmatpush3.msk.msra.mxu0 %vm536_vm0, %v439_v0  ;;  %1517 = vmatpush3.msk.msra.mxu1 %vm536_vm0, %v439_v0  ;;  %s1389_s7 = sshll.u32 %s254_s29, 3  ;;  %s1430_s8 = sshll.u32 %s1647_s21, 7 }
  0x19   : > { %s2312_s9 = smov (!%p259_p11, %s1390_s9), 63  ;;  %1576 = vset.pattern.permute.xlu1 %v1657_v1  ;;  %1575 = vset.pattern.permute.xlu0 %v1657_v1  ;;  %s1292_s14 = scalar_lea.sflag [#allocation3], %s254_s29 }
  0x1a   : > { %s1391_s10 = sshll.u32 %s2312_s9, 3  ;;  %s256_s9 = scalar_lea.vmem [#allocation2], %s1389_s7 }
  0x1b   : > { %s1756_s13 = scalar_lea.vmem %s2280_s0, %s1391_s10  ;;  %s1924_s16 = scalar_lea.vmem %s2281_s1, %s1391_s10 }
  0x1c   : > { %v278_v2 = vld [vmem:[%s1756_s13] sm:$0xff]  ;;  %v279_v4 = vld [vmem:[%s1756_s13 + $0x8] sm:$0xff]  ;;  %v280_v7 = vld [vmem:[%s1756_s13 + $0x10] sm:$0xff]  ;;  %s1305_s10 = sshll.u32 %s256_s9, 4  ;;  %s1658_s21 = smov [#allocation2]   ;;  %s2233_s10 = int_to_ptr.vmem [resolvable:$true] %s1305_s10 }
  0x1d   : > { %v1760_v3 = vld [vmem:[%s1756_s13 + $0x80] sm:$0xff]  ;;  %v310_v5 = vmul.f32 %v278_v2, %v278_v2  ;;  %1468 = vmatprep.mubr.msk.f32.mxu0 %vm342_vm1, %v278_v2  ;;  %v1767_v6 = vld [vmem:[%s1756_s13 + $0x88] sm:$0xff]  ;;  %v1771_v8 = vld [vmem:[%s1756_s13 + $0x90] sm:$0xff]  ;;  %v311_v9 = vmul.f32 %v279_v4, %v279_v4  ;;  %v312_v10 = vmul.f32 %v280_v7, %v280_v7  ;;  %s1577_s15 = scalar_lea.vmem %s2233_s10, 128 }
  0x1e   : > { %1492 = vmatprep.mubr.msk.f32.mxu1 %vm342_vm1, %v1760_v3  ;;  %1469 = vmatmul.mubr.msk.f32.vlgmr.msra.gmra.mrb[0].mxu0 %vm342_vm1, %v279_v4  ;;  %v281_v11 = vld [vmem:[%s1756_s13 + $0x18] sm:$0xff]  ;;  %v282_v12 = vld [vmem:[%s1756_s13 + $0x20] sm:$0xff]  ;;  %v283_v16 = vld [vmem:[%s1756_s13 + $0x28] sm:$0xff]  ;;  %v326_v0 = vmul.f32 %v1760_v3, %v1760_v3  ;;  %v327_v4 = vmul.f32 %v1767_v6, %v1767_v6  ;;  %p1578_p12 = scmp.ne.s32.totalorder %s2233_s10, %s1577_s15 }
  0x1f   : > { %1493 = vmatmul.mubr.msk.f32.vlgmr.msra.gmra.mrb[0].mxu1 %vm342_vm1, %v1767_v6  ;;  %v343_v13 = vsel %vm342_vm1, %v310_v5, 0.0  ;;  %1471 = vmatprep.mubr.msk.f32.mxu0 %vm342_vm1, %v280_v7  ;;  %v1783_v14 = vld [vmem:[%s1756_s13 + $0x98] sm:$0xff]  ;;  %v313_v15 = vmul.f32 %v281_v11, %v281_v11  ;;  %v349_v17 = vsel %vm342_vm1, %v312_v10, 0.0  ;;  %v1788_v18 = vld [vmem:[%s1756_s13 + $0xa0] sm:$0xff]  ;;  %v346_v19 = vsel %vm342_vm1, %v311_v9, 0.0  ;;  %v284_v23 = vld [vmem:[%s1756_s13 + $0x30] sm:$0xff] }
  0x20   : > { %1495 = vmatprep.mubr.msk.f32.mxu1 %vm342_vm1, %v1771_v8  ;;  %344 = vadd.xlane.f32.xlu0 %v343_v13  ;;  %v314_v20 = vmul.f32 %v282_v12, %v282_v12  ;;  %v315_v22 = vmul.f32 %v283_v16, %v283_v16  ;;  %v1800_v24 = vld [vmem:[%s1756_s13 + $0xa8] sm:$0xff]  ;;  %v285_v25 = vld [vmem:[%s1756_s13 + $0x38] sm:$0xff]  ;;  %v1804_v26 = vld [vmem:[%s1756_s13 + $0xb0] sm:$0xff]  ;;  %v316_v28 = vmul.f32 %v284_v23, %v284_v23  ;;  %v391_v5 = vsel %vm342_vm1, %v326_v0, 0.0  ;;  %p1579_p13 = pnand %p1578_p12, %p1729_p4 }
  0x21   : > { %350 = vadd.xlane.f32.xlu1 %v349_v17  ;;  %v352_v21 = vsel %vm342_vm1, %v313_v15, 0.0  ;;  %v317_v30 = vmul.f32 %v285_v25, %v285_v25  ;;  %v286_v31 = vld [vmem:[%s1756_s13 + $0x40] sm:$0xff]  ;;  %v1816_v32 = vld [vmem:[%s1756_s13 + $0xb8] sm:$0xff]  ;;  %v287_v33 = vld [vmem:[%s1756_s13 + $0x48] sm:$0xff]  ;;  %v328_v7 = vmul.f32 %v1771_v8, %v1771_v8  ;;  %v394_v3 = vsel %vm342_vm1, %v327_v4, 0.0 }
  0x22   : > { %1472 = vmatmul.mubr.msk.f32.gmra.mrb[2].mxu0 %vm342_vm1, %v281_v11  ;;  %v355_v27 = vsel %vm342_vm1, %v314_v20, 0.0  ;;  %v358_v29 = vsel %vm342_vm1, %v315_v22, 0.0  ;;  %v1820_v34 = vld [vmem:[%s1756_s13 + $0xc0] sm:$0xff]  ;;  %v361_v35 = vsel %vm342_vm1, %v316_v28, 0.0  ;;  %v318_v36 = vmul.f32 %v286_v31, %v286_v31  ;;  %v288_v39 = vld [vmem:[%s1756_s13 + $0x50] sm:$0xff]  ;;  %v1832_v40 = vld [vmem:[%s1756_s13 + $0xc8] sm:$0xff]  ;;  %p1580_p0 = pneg %p1579_p13 }
  0x23   : > { %1496 = vmatmul.mubr.msk.f32.gmra.mrb[2].mxu1 %vm342_vm1, %v1783_v14  ;;  %1474 = vmatprep.mubr.msk.f32.mxu0 %vm342_vm1, %v282_v12  ;;  %v364_v37 = vsel %vm342_vm1, %v317_v30, 0.0  ;;  %v319_v38 = vmul.f32 %v287_v33, %v287_v33  ;;  %v289_v41 = vld [vmem:[%s1756_s13 + $0x58] sm:$0xff]  ;;  %v1836_v42 = vld [vmem:[%s1756_s13 + $0xd0] sm:$0xff]  ;;  %v320_v44 = vmul.f32 %v288_v39, %v288_v39  ;;  %v290_v47 = vld [vmem:[%s1756_s13 + $0x60] sm:$0xff]  ;;  %v329_v9 = vmul.f32 %v1783_v14, %v1783_v14 }
  0x24   : > { %1498 = vmatprep.mubr.msk.f32.mxu1 %vm342_vm1, %v1788_v18  ;;  %347 = vadd.xlane.f32.xlu0 %v346_v19  ;;  %v367_v43 = vsel %vm342_vm1, %v318_v36, 0.0  ;;  %v321_v46 = vmul.f32 %v289_v41, %v289_v41  ;;  %v1848_v48 = vld [vmem:[%s1756_s13 + $0xd8] sm:$0xff]  ;;  %v291_v49 = vld [vmem:[%s1756_s13 + $0x68] sm:$0xff]  ;;  %v1852_v50 = vld [vmem:[%s1756_s13 + $0xe0] sm:$0xff]  ;;  %v322_v52 = vmul.f32 %v290_v47, %v290_v47  ;;  %v397_v10 = vsel %vm342_vm1, %v328_v7, 0.0 }
  0x25   : > { %353 = vadd.xlane.f32.xlu1 %v352_v21  ;;  %v370_v45 = vsel %vm342_vm1, %v319_v38, 0.0  ;;  %v373_v51 = vsel %vm342_vm1, %v320_v44, 0.0  ;;  %v323_v54 = vmul.f32 %v291_v49, %v291_v49  ;;  %v292_v55 = vld [vmem:[%s1756_s13 + $0x70] sm:$0xff]  ;;  %v307_v56 = vld [vmem:[%s1756_s13 + $0xe8] sm:$0xff]  ;;  %v293_v57 = vld [vmem:[%s1756_s13 + $0x78] sm:$0xff]  ;;  %v330_v11 = vmul.f32 %v1788_v18, %v1788_v18 }
  0x26   : > { %1475 = vmatmul.mubr.msk.f32.gmra.mrb[4].mxu0 %vm342_vm1, %v283_v16  ;;  %v376_v53 = vsel %vm342_vm1, %v321_v46, 0.0  ;;  %v308_v58 = vld [vmem:[%s1756_s13 + $0xf0] sm:$0xff]  ;;  %v379_v59 = vsel %vm342_vm1, %v322_v52, 0.0  ;;  %v324_v60 = vmul.f32 %v292_v55, %v292_v55  ;;  %v325_v62 = vmul.f32 %v293_v57, %v293_v57  ;;  %v309_v63 = vld [vmem:[%s1756_s13 + $0xf8] sm:$0xff]  ;;  %v868_v36 = vld [vmem:[%s1924_s16] sm:$0xff]  ;;  %s2231_s13 = scalar_lea.hbm %s2285_s5, %s1430_s8 }
  0x27   : > { %1499 = vmatmul.mubr.msk.f32.gmra.mrb[4].mxu1 %vm342_vm1, %v1800_v24  ;;  %1477 = vmatprep.mubr.msk.f32.mxu0 %vm342_vm1, %v284_v23  ;;  %v382_v61 = vsel %vm342_vm1, %v323_v54, 0.0  ;;  %v400_v6 = vsel %vm342_vm1, %v329_v9, 0.0  ;;  %v331_v12 = vmul.f32 %v1800_v24, %v1800_v24  ;;  %v403_v8 = vsel %vm342_vm1, %v330_v11, 0.0  ;;  %v871_v38 = vld [vmem:[%s1924_s16 + $0x18] sm:$0xff]  ;;  %v876_v4 = vld [vmem:[%s1924_s16 + $0x40] sm:$0xff]  ;;  %v878_v11 = vld [vmem:[%s1924_s16 + $0x50] sm:$0xff] }
  0x28   : > { %1501 = vmatprep.mubr.msk.f32.mxu1 %vm342_vm1, %v1804_v26  ;;  %356 = vadd.xlane.f32.xlu0 %v355_v27  ;;  %v385_v1 = vsel %vm342_vm1, %v324_v60, 0.0  ;;  %v388_v2 = vsel %vm342_vm1, %v325_v62, 0.0  ;;  %v332_v13 = vmul.f32 %v1804_v26, %v1804_v26  ;;  %v333_v15 = vmul.f32 %v1816_v32, %v1816_v32  ;;  %v879_v44 = vld [vmem:[%s1924_s16 + $0x58] sm:$0xff]  ;;  %v885_v62 = vld [vmem:[%s1924_s16 + $0x88] sm:$0xff] }
  0x29   : > { %359 = vadd.xlane.f32.xlu1 %v358_v29  ;;  %v406_v14 = vsel %vm342_vm1, %v331_v12, 0.0  ;;  %v334_v17 = vmul.f32 %v1820_v34, %v1820_v34  ;;  %v335_v19 = vmul.f32 %v1832_v40, %v1832_v40  ;;  %v336_v21 = vmul.f32 %v1836_v42, %v1836_v42 }
  0x2a   : > { %1478 = vmatmul.mubr.msk.f32.gmra.mrb[6].mxu0 %vm342_vm1, %v285_v25  ;;  %v409_v16 = vsel %vm342_vm1, %v332_v13, 0.0  ;;  %v412_v18 = vsel %vm342_vm1, %v333_v15, 0.0  ;;  %v337_v23 = vmul.f32 %v1848_v48, %v1848_v48  ;;  %v338_v25 = vmul.f32 %v1852_v50, %v1852_v50  ;;  %v880_v15 = vld [vmem:[%s1924_s16 + $0x60] sm:$0xff] }
  0x2b   : > { %1502 = vmatmul.mubr.msk.f32.gmra.mrb[6].mxu1 %vm342_vm1, %v1816_v32  ;;  %1480 = vmatprep.mubr.msk.f32.mxu0 %vm342_vm1, %v286_v31  ;;  %v415_v20 = vsel %vm342_vm1, %v334_v17, 0.0  ;;  %v418_v22 = vsel %vm342_vm1, %v335_v19, 0.0  ;;  %v421_v24 = vsel %vm342_vm1, %v336_v21, 0.0  ;;  %v339_v27 = vmul.f32 %v307_v56, %v307_v56  ;;  %v882_v21 = vld [vmem:[%s1924_s16 + $0x70] sm:$0xff] }
  0x2c   : > { %1504 = vmatprep.mubr.msk.f32.mxu1 %vm342_vm1, %v1820_v34  ;;  %362 = vadd.xlane.f32.xlu0 %v361_v35  ;;  %v424_v26 = vsel %vm342_vm1, %v337_v23, 0.0  ;;  %v427_v28 = vsel %vm342_vm1, %v338_v25, 0.0  ;;  %v340_v29 = vmul.f32 %v308_v58, %v308_v58  ;;  %v341_v31 = vmul.f32 %v309_v63, %v309_v63  ;;  %v869_v34 = vld [vmem:[%s1924_s16 + $0x8] sm:$0xff]  ;;  %v870_v35 = vld [vmem:[%s1924_s16 + $0x10] sm:$0xff] }
  0x2d   : > { %365 = vadd.xlane.f32.xlu1 %v364_v37  ;;  %v430_v30 = vsel %vm342_vm1, %v339_v27, 0.0  ;;  %vm901_vm2 = vcmp.eq.s32.totalorder %v869_v34, 0  ;;  %vm902_vm3 = vcmp.eq.s32.totalorder %v870_v35, 0  ;;  %vm900_vm4 = vcmp.eq.s32.totalorder %v868_v36, 0  ;;  %v884_v27 = vld [vmem:[%s1924_s16 + $0x80] sm:$0xff] }
  0x2e   : > { %1481 = vmatmul.mubr.msk.f32.gmra.mrb[8].mxu0 %vm342_vm1, %v287_v33  ;;  %v433_v32 = vsel %vm342_vm1, %v340_v29, 0.0  ;;  %v436_v33 = vsel %vm342_vm1, %v341_v31, 0.0  ;;  %v933_v37 = vsel %vm901_vm2, 255, %v869_v34  ;;  %vm903_vm6 = vcmp.eq.s32.totalorder %v871_v38, 0  ;;  %v897_v34 = vld [vmem:[%s1924_s16 + $0xe8] sm:$0xff] }
  0x2f   : > { %1505 = vmatmul.mubr.msk.f32.gmra.mrb[8].mxu1 %vm342_vm1, %v1832_v40  ;;  %1483 = vmatprep.mubr.msk.f32.mxu0 %vm342_vm1, %v288_v39  ;;  %v877_v39 = vld [vmem:[%s1924_s16 + $0x48] sm:$0xff]  ;;  %vm965_vm5 = vcmp.eq.s32.totalorder %v933_v37, 255  ;;  %v934_v40 = vsel %vm902_vm3, 255, %v870_v35  ;;  %vm911_vm11 = vcmp.eq.s32.totalorder %v879_v44, 0 }
  0x30   : > { %1507 = vmatprep.mubr.msk.f32.mxu1 %vm342_vm1, %v1836_v42  ;;  %368 = vadd.xlane.f32.xlu0 %v367_v43  ;;  %vm909_vm7 = vcmp.eq.s32.totalorder %v877_v39, 0  ;;  %v997_v42 = vsel %vm965_vm5, 0, %v933_v37  ;;  %v872_v43 = vld [vmem:[%s1924_s16 + $0x20] sm:$0xff]  ;;  %vm966_vm8 = vcmp.eq.s32.totalorder %v934_v40, 255  ;;  %v943_v52 = vsel %vm911_vm11, 255, %v879_v44 }
  0x31   : > { %371 = vadd.xlane.f32.xlu1 %v370_v45  ;;  %v935_v45 = vsel %vm903_vm6, 255, %v871_v38  ;;  %v941_v46 = vsel %vm909_vm7, 255, %v877_v39  ;;  %vm904_vm10 = vcmp.eq.s32.totalorder %v872_v43, 0  ;;  %vm917_vm7 = vcmp.eq.s32.totalorder %v885_v62, 0  ;;  %v888_v39 = vld [vmem:[%s1924_s16 + $0xa0] sm:$0xff] }
  0x32   : > { %1484 = vmatmul.mubr.msk.f32.gmra.mrb[10].mxu0 %vm342_vm1, %v289_v41  ;;  %v932_v41 = vsel %vm900_vm4, 255, %v868_v36  ;;  %vm967_vm12 = vcmp.eq.s32.totalorder %v935_v45, 255  ;;  %vm973_vm13 = vcmp.eq.s32.totalorder %v941_v46, 255 }
  0x33   : > { %1508 = vmatmul.mubr.msk.f32.gmra.mrb[10].mxu1 %vm342_vm1, %v1848_v48  ;;  %1486 = vmatprep.mubr.msk.f32.mxu0 %vm342_vm1, %v290_v47  ;;  %vm964_vm9 = vcmp.eq.s32.totalorder %v932_v41, 255  ;;  %v998_v47 = vsel %vm966_vm8, 0, %v934_v40  ;;  %v1005_v54 = vsel %vm973_vm13, 0, %v941_v46  ;;  %v899_v40 = vld [vmem:[%s1924_s16 + $0xf8] sm:$0xff] }
  0x34   : > { %1510 = vmatprep.mubr.msk.f32.mxu1 %vm342_vm1, %v1852_v50  ;;  %374 = vadd.xlane.f32.xlu0 %v373_v51  ;;  %v996_v48 = vsel %vm964_vm9, 0, %v932_v41  ;;  %v881_v50 = vld [vmem:[%s1924_s16 + $0x68] sm:$0xff]  ;;  %v936_v51 = vsel %vm904_vm10, 255, %v872_v43  ;;  %vm908_vm10 = vcmp.eq.s32.totalorder %v876_v4, 0 }
  0x35   : > { %377 = vadd.xlane.f32.xlu1 %v376_v53  ;;  %vm913_vm15 = vcmp.eq.s32.totalorder %v881_v50, 0  ;;  %v999_v53 = vsel %vm967_vm12, 0, %v935_v45  ;;  %vm968_vm0 = vcmp.eq.s32.totalorder %v936_v51, 255  ;;  %v940_v12 = vsel %vm908_vm10, 255, %v876_v4  ;;  %v890_v45 = vld [vmem:[%s1924_s16 + $0xb0] sm:$0xff] }
  0x36   : > { %1487 = vmatmul.mubr.msk.f32.gmra.mrb[12].mxu0 %vm342_vm1, %v291_v49  ;;  %v873_v49 = vld [vmem:[%s1924_s16 + $0x28] sm:$0xff]  ;;  %vm916_vm10 = vcmp.eq.s32.totalorder %v884_v27, 0 }
  0x37   : > { %1511 = vmatmul.mubr.msk.f32.gmra.mrb[12].mxu1 %vm342_vm1, %v307_v56  ;;  %1489 = vmatprep.mubr.msk.f32.mxu0 %vm342_vm1, %v292_v55  ;;  %vm905_vm14 = vcmp.eq.s32.totalorder %v873_v49, 0  ;;  %v874_v55 = vld [vmem:[%s1924_s16 + $0x30] sm:$0xff]  ;;  %v883_v56 = vld [vmem:[%s1924_s16 + $0x78] sm:$0xff]  ;;  %v948_v35 = vsel %vm916_vm10, 255, %v884_v27 }
  0x38   : > { %1513 = vmatprep.mubr.msk.f32.mxu1 %vm342_vm1, %v308_v58  ;;  %380 = vadd.xlane.f32.xlu0 %v379_v59  ;;  %v945_v58 = vsel %vm913_vm15, 255, %v881_v50  ;;  %vm906_vm2 = vcmp.eq.s32.totalorder %v874_v55, 0  ;;  %vm915_vm3 = vcmp.eq.s32.totalorder %v883_v56, 0  ;;  %v1000_v59 = vsel %vm968_vm0, 0, %v936_v51  ;;  %v892_v50 = vld [vmem:[%s1924_s16 + $0xc0] sm:$0xff] }
  0x39   : > { %383 = vadd.xlane.f32.xlu1 %v382_v61  ;;  %v875_v61 = vld [vmem:[%s1924_s16 + $0x38] sm:$0xff]  ;;  %vm977_vm5 = vcmp.eq.s32.totalorder %v945_v58, 255  ;;  %v947_v0 = vsel %vm915_vm3, 255, %v883_v56  ;;  %vm972_vm0 = vcmp.eq.s32.totalorder %v940_v12, 255 }
  0x3a   : > { %1490 = vmatmul.mubr.msk.f32.gmra.mrb[14].mxu0 %vm342_vm1, %v293_v57  ;;  %v937_v57 = vsel %vm905_vm14, 255, %v873_v49  ;;  %vm907_vm6 = vcmp.eq.s32.totalorder %v875_v61, 0  ;;  %vm979_vm9 = vcmp.eq.s32.totalorder %v947_v0, 255  ;;  %vm910_vm14 = vcmp.eq.s32.totalorder %v878_v11, 0 }
  0x3b   : > { %1514 = vmatmul.mubr.msk.f32.gmra.mrb[14].mxu1 %vm342_vm1, %v309_v63  ;;  %vm975_vm1 = vcmp.eq.s32.totalorder %v943_v52, 255  ;;  %vm969_vm4 = vcmp.eq.s32.totalorder %v937_v57, 255  ;;  %v938_v63 = vsel %vm906_vm2, 255, %v874_v55  ;;  %v939_v7 = vsel %vm907_vm6, 255, %v875_v61 }
  0x3c   : > { %386 = vadd.xlane.f32.xlu0 %v385_v1  ;;  %v1007_v60 = vsel %vm975_vm1, 0, %v943_v52  ;;  %v1001_v1 = vsel %vm969_vm4, 0, %v937_v57  ;;  %vm970_vm8 = vcmp.eq.s32.totalorder %v938_v63, 255  ;;  %vm971_vm12 = vcmp.eq.s32.totalorder %v939_v7, 255  ;;  %v896_v57 = vld [vmem:[%s1924_s16 + $0xe0] sm:$0xff] }
  0x3d   : > { %389 = vadd.xlane.f32.xlu1 %v388_v2  ;;  %v1009_v2 = vsel %vm977_vm5, 0, %v945_v58  ;;  %v1002_v9 = vsel %vm970_vm8, 0, %v938_v63  ;;  %v1003_v13 = vsel %vm971_vm12, 0, %v939_v7  ;;  %v942_v17 = vsel %vm910_vm14, 255, %v878_v11 }
  0x3e   : > { %vm912_vm2 = vcmp.eq.s32.totalorder %v880_v15, 0  ;;  %v1004_v19 = vsel %vm972_vm0, 0, %v940_v12  ;;  %vm974_vm4 = vcmp.eq.s32.totalorder %v942_v17, 255  ;;  %vm914_vm6 = vcmp.eq.s32.totalorder %v882_v21, 0 }
  0x3f   : > { %v944_v23 = vsel %vm912_vm2, 255, %v880_v15  ;;  %v1006_v25 = vsel %vm974_vm4, 0, %v942_v17  ;;  %v946_v29 = vsel %vm914_vm6, 255, %v882_v21  ;;  %vm980_vm0 = vcmp.eq.s32.totalorder %v948_v35, 255 }
  0x40   : > { %392 = vadd.xlane.f32.xlu0 %v391_v5  ;;  %v887_v5 = vld [vmem:[%s1924_s16 + $0x98] sm:$0xff]  ;;  %vm976_vm8 = vcmp.eq.s32.totalorder %v944_v23, 255  ;;  %vm978_vm12 = vcmp.eq.s32.totalorder %v946_v29, 255  ;;  %vm920_vm2 = vcmp.eq.s32.totalorder %v888_v39, 0  ;;  %v1012_v43 = vsel %vm980_vm0, 0, %v948_v35 }
  0x41   : > { %395 = vadd.xlane.f32.xlu1 %v394_v3  ;;  %v949_v3 = vsel %vm917_vm7, 255, %v885_v62  ;;  %vm919_vm11 = vcmp.eq.s32.totalorder %v887_v5, 0  ;;  %v1008_v31 = vsel %vm976_vm8, 0, %v944_v23  ;;  %v1010_v37 = vsel %vm978_vm12, 0, %v946_v29  ;;  %v2009_v35 = vld [vmem:[%s2283_s3] ss:$0 sm:$0xff] }
  0x42   : > { %vm981_vm13 = vcmp.eq.s32.totalorder %v949_v3, 255  ;;  %v952_v46 = vsel %vm920_vm2, 255, %v888_v39  ;;  %vm922_vm6 = vcmp.eq.s32.totalorder %v890_v45, 0 }
  0x43   : > { %v954_v51 = vsel %vm922_vm6, 255, %v890_v45 }
  0x44   : > { %398 = vadd.xlane.f32.xlu0 %v397_v10  ;;  %v1011_v10 = vsel %vm979_vm9, 0, %v947_v0  ;;  %vm986_vm10 = vcmp.eq.s32.totalorder %v954_v51, 255 }
  0x45   : > { %401 = vadd.xlane.f32.xlu1 %v400_v6  ;;  %v889_v6 = vld [vmem:[%s1924_s16 + $0xa8] sm:$0xff]  ;;  %v1018_v56 = vsel %vm986_vm10, 0, %v954_v51 }
  0x46   : > { %vm921_vm15 = vcmp.eq.s32.totalorder %v889_v6, 0 }
  0x48   : > { %404 = vadd.xlane.f32.xlu0 %v403_v8  ;;  %v951_v8 = vsel %vm919_vm11, 255, %v887_v5 }
  0x49   : > { %407 = vadd.xlane.f32.xlu1 %v406_v14  ;;  %v1013_v14 = vsel %vm981_vm13, 0, %v949_v3  ;;  %vm983_vm1 = vcmp.eq.s32.totalorder %v951_v8, 255 }
  0x4c   : > { %410 = vadd.xlane.f32.xlu0 %v409_v16  ;;  %v891_v16 = vld [vmem:[%s1924_s16 + $0xb8] sm:$0xff] }
  0x4d   : > { %413 = vadd.xlane.f32.xlu1 %v412_v18  ;;  %v953_v18 = vsel %vm921_vm15, 255, %v889_v6  ;;  %vm923_vm3 = vcmp.eq.s32.totalorder %v891_v16, 0  ;;  %vm929_vm15 = vcmp.eq.s32.totalorder %v897_v34, 0 }
  0x4e   : > { %vm985_vm5 = vcmp.eq.s32.totalorder %v953_v18, 255 }
  0x50   : > { %416 = vadd.xlane.f32.xlu0 %v415_v20  ;;  %v1015_v20 = vsel %vm983_vm1, 0, %v951_v8 }
  0x51   : > { %419 = vadd.xlane.f32.xlu1 %v418_v22  ;;  %v893_v22 = vld [vmem:[%s1924_s16 + $0xc8] sm:$0xff] }
  0x52   : > { %vm925_vm7 = vcmp.eq.s32.totalorder %v893_v22, 0 }
  0x54   : > { %422 = vadd.xlane.f32.xlu0 %v421_v24  ;;  %v955_v24 = vsel %vm923_vm3, 255, %v891_v16  ;;  %vm931_vm3 = vcmp.eq.s32.totalorder %v899_v40, 0 }
  0x55   : > { %425 = vadd.xlane.f32.xlu1 %v424_v26  ;;  %v1017_v26 = vsel %vm985_vm5, 0, %v953_v18  ;;  %vm987_vm9 = vcmp.eq.s32.totalorder %v955_v24, 255 }
  0x58   : > { %428 = vadd.xlane.f32.xlu0 %v427_v28  ;;  %v895_v28 = vld [vmem:[%s1924_s16 + $0xd8] sm:$0xff] }
  0x59   : > { %431 = vadd.xlane.f32.xlu1 %v430_v30  ;;  %v957_v30 = vsel %vm925_vm7, 255, %v893_v22  ;;  %vm927_vm11 = vcmp.eq.s32.totalorder %v895_v28, 0  ;;  %vm984_vm7 = vcmp.eq.s32.totalorder %v952_v46, 255 }
  0x5a   : > { %vm989_vm13 = vcmp.eq.s32.totalorder %v957_v30, 255  ;;  %v959_v36 = vsel %vm927_vm11, 255, %v895_v28  ;;  %v1016_v52 = vsel %vm984_vm7, 0, %v952_v46 }
  0x5b   : > { %v1021_v38 = vsel %vm989_vm13, 0, %v957_v30  ;;  %vm991_vm1 = vcmp.eq.s32.totalorder %v959_v36, 255  ;;  %vm928_vm13 = vcmp.eq.s32.totalorder %v896_v57, 0 }
  0x5c   : > { %434 = vadd.xlane.f32.xlu0 %v433_v32  ;;  %v1019_v32 = vsel %vm987_vm9, 0, %v955_v24  ;;  %v1023_v44 = vsel %vm991_vm1, 0, %v959_v36  ;;  %vm924_vm9 = vcmp.eq.s32.totalorder %v892_v50, 0  ;;  %v960_v61 = vsel %vm928_vm13, 255, %v896_v57 }
  0x5d   : > { %437 = vadd.xlane.f32.xlu1 %v436_v33  ;;  %v886_v33 = vld [vmem:[%s1924_s16 + $0x90] sm:$0xff]  ;;  %v956_v55 = vsel %vm924_vm9, 255, %v892_v50  ;;  %vm992_vm0 = vcmp.eq.s32.totalorder %v960_v61, 255  ;;  %v2027_v50 = vld [vmem:[%s2284_s4] ss:$0 sm:$0xff] }
  0x5e   : > { %vm918_vm14 = vcmp.eq.s32.totalorder %v886_v33, 0  ;;  %vm988_vm12 = vcmp.eq.s32.totalorder %v956_v55, 255 }
  0x5f   : > { %v950_v41 = vsel %vm918_vm14, 255, %v886_v33 }
  0x60   : > { %vm982_vm4 = vcmp.eq.s32.totalorder %v950_v41, 255 }
  0x6e   : > { %1033 = vperm.xlu1 %1576, %v997_v42   ;;  %v961_v42 = vsel %vm929_vm15, 255, %v897_v34 }
  0x6f   : > { %vm993_vm5 = vcmp.eq.s32.totalorder %v961_v42, 255 }
  0x70   : > { %v1025_v49 = vsel %vm993_vm5, 0, %v961_v42 }
  0x72   : > { %1036 = vperm.xlu1 %1576, %v998_v47   ;;  %1030 = vperm.xlu0 %1575, %v996_v48   ;;  %v963_v47 = vsel %vm931_vm3, 255, %v899_v40  ;;  %v1014_v48 = vsel %vm982_vm4, 0, %v950_v41 }
  0x73   : > { %vm995_vm8 = vcmp.eq.s32.totalorder %v963_v47, 255 }
  0x76   : > { %1039 = vperm.xlu1 %1576, %v999_v53   ;;  %1057 = vperm.xlu0 %1575, %v1005_v54   ;;  %v1027_v53 = vsel %vm995_vm8, 0, %v963_v47  ;;  %v894_v54 = vld [vmem:[%s1924_s16 + $0xd0] sm:$0xff] }
  0x77   : > { %vm926_vm11 = vcmp.eq.s32.totalorder %v894_v54, 0 }
  0x78   : > { %v958_v58 = vsel %vm926_vm11, 255, %v894_v54 }
  0x79   : > { %vm990_vm14 = vcmp.eq.s32.totalorder %v958_v58, 255 }
  0x7a   : > { %1042 = vperm.xlu1 %1576, %v1000_v59   ;;  %1063 = vperm.xlu0 %1575, %v1007_v60   ;;  %v1020_v59 = vsel %vm988_vm12, 0, %v956_v55  ;;  %v898_v60 = vld [vmem:[%s1924_s16 + $0xf0] sm:$0xff]  ;;  %v1022_v62 = vsel %vm990_vm14, 0, %v958_v58  ;;  %s1581_s16 = sshll.u32 %s1658_s21, 4  ;;  %s1582_s16 = int_to_ptr.vmem [resolvable:$false] %s1581_s16 }
  0x7b   : > { %vm930_vm15 = vcmp.eq.s32.totalorder %v898_v60, 0  ;;  %s1583_s17 = scalar_lea.vmem %s1582_s16, 256  ;;  %p1584_p1 = scmp.lt.s32.totalorder %s2233_s10, %s1582_s16 }
  0x7c   : > { %v962_v0 = vsel %vm930_vm15, 255, %v898_v60  ;;  %p1585_p2 = scmp.lt.s32.totalorder %s1583_s17, %s1577_s15 }
  0x7d   : > { %vm994_vm1 = vcmp.eq.s32.totalorder %v962_v0, 255 }
  0x7e   : > { %1045 = vperm.xlu1 %1576, %v1001_v1   ;;  %1069 = vperm.xlu0 %1575, %v1009_v2   ;;  %v1024_v2 = vsel %vm992_vm0, 0, %v960_v61  ;;  %v1026_v7 = vsel %vm994_vm1, 0, %v962_v0  ;;  %p1586_p3 = por %p1585_p2, %p1584_p1 }
  0x80   : > { %p1587_p5 = pnand %p1586_p3, %p1580_p0 }
  0x82   : > { %1048 = vperm.xlu1 %1576, %v1002_v9   ;;  %1075 = vperm.xlu0 %1575, %v1011_v10  }
  0x86   : > { %1051 = vperm.xlu1 %1576, %v1003_v13   ;;  %1081 = vperm.xlu0 %1575, %v1013_v14  }
  0x8a   : > { %1054 = vperm.xlu1 %1576, %v1004_v19   ;;  %1087 = vperm.xlu0 %1575, %v1015_v20  }
  0x8e   : > { %1060 = vperm.xlu1 %1576, %v1006_v25   ;;  %1093 = vperm.xlu0 %1575, %v1017_v26  }
  0x92   : > { %1066 = vperm.xlu1 %1576, %v1008_v31   ;;  %1099 = vperm.xlu0 %1575, %v1019_v32  }
  0x96   : > { %1072 = vperm.xlu1 %1576, %v1010_v37   ;;  %1105 = vperm.xlu0 %1575, %v1021_v38  }
  0x9a   : > { %1078 = vperm.xlu1 %1576, %v1012_v43   ;;  %1111 = vperm.xlu0 %1575, %v1023_v44  }
  0x9e   : > { %1084 = vperm.xlu1 %1576, %v1014_v48   ;;  %1117 = vperm.xlu0 %1575, %v1025_v49  }
  0xa2   : > { %1090 = vperm.xlu1 %1576, %v1016_v52   ;;  %1123 = vperm.xlu0 %1575, %v1027_v53  }
  0xa6   : > { %1096 = vperm.xlu1 %1576, %v1018_v56  }
  0xaa   : > { %1102 = vperm.xlu1 %1576, %v1020_v59  }
  0xad   : > { %v345_v63 = vpop.xlane.xlu0 %344 }
  0xae   : > { %1108 = vperm.xlu1 %1576, %v1022_v62   ;;  %v351_v1 = vpop.xlane.xlu1 %350  ;;  %v772_v46 = vadd.f32 %v2009_v35, %v345_v63 }
  0xaf   : > { %v774_v53 = vadd.f32 %v2009_v35, %v351_v1 }
  0xb1   : > { %v348_v4 = vpop.xlane.xlu0 %347 }
  0xb2   : > { %1114 = vperm.xlu1 %1576, %v1024_v2   ;;  %v354_v5 = vpop.xlane.xlu1 %353  ;;  %v773_v38 = vadd.f32 %v2009_v35, %v348_v4 }
  0xb3   : > { %v775_v54 = vadd.f32 %v2009_v35, %v354_v5 }
  0xb5   : > { %v1958_v3 = vpop.xlane.xlu0 %356 }
  0xb6   : > { %1120 = vperm.xlu1 %1576, %v1026_v7   ;;  %v360_v9 = vpop.xlane.xlu1 %359 }
  0xb7   : > { %v777_v59 = vadd.f32 %v2009_v35, %v360_v9 }
  0xb9   : > { %v1960_v10 = vpop.xlane.xlu0 %362 }
  0xba   : > { %v1962_v11 = vpop.xlane.xlu1 %365 }
  0xbd   : > { %v1964_v6 = vpop.xlane.xlu0 %368 }
  0xbe   : > { %v1966_v12 = vpop.xlane.xlu1 %371 }
  0xc1   : > { %v1968_v8 = vpop.xlane.xlu0 %374 }
  0xc2   : > { %v1970_v13 = vpop.xlane.xlu1 %377 }
  0xc5   : > { %v1972_v14 = vpop.xlane.xlu0 %380 }
  0xc6   : > { %v1974_v15 = vpop.xlane.xlu1 %383 }
  0xc9   : > { %v1976_v16 = vpop.xlane.xlu0 %386 }
  0xca   : > { %v1978_v17 = vpop.xlane.xlu1 %389 }
  0xcd   : > { %v1980_v18 = vpop.xlane.xlu0 %392 }
  0xce   : > { %v396_v19 = vpop.xlane.xlu1 %395 }
  0xcf   : > { %v2013_v39 = vadd.f32 %v2009_v35, %v396_v19 }
  0xd1   : > { %v1982_v20 = vpop.xlane.xlu0 %398 }
  0xd2   : > { %v402_v21 = vpop.xlane.xlu1 %401 }
  0xd3   : > { %v2037_v60 = vadd.f32 %v2009_v35, %v402_v21 }
  0xd5   : > { %v1984_v22 = vpop.xlane.xlu0 %404 }
  0xd6   : > { %v408_v23 = vpop.xlane.xlu1 %407 }
  0xd7   : > { %v2044_v1 = vadd.f32 %v2009_v35, %v408_v23 }
  0xd9   : > { %v1986_v24 = vpop.xlane.xlu0 %410 }
  0xda   : > { %v1988_v25 = vpop.xlane.xlu1 %413 }
  0xdd   : > { %v1990_v26 = vpop.xlane.xlu0 %416 }
  0xde   : > { %v1992_v27 = vpop.xlane.xlu1 %419 }
  0xe1   : > { %v1994_v28 = vpop.xlane.xlu0 %422 }
  0xe2   : > { %v1996_v29 = vpop.xlane.xlu1 %425 }
  0xe5   : > { %v2000_v31 = vpop.xlane.xlu0 %428 }
  0xe6   : > { %v1998_v30 = vpop.xlane.xlu1 %431 }
  0xe9   : > { %v2004_v33 = vpop.xlane.xlu0 %434 }
  0xea   : > { %v2002_v32 = vpop.xlane.xlu1 %437 }
  0xee   : > { %v1034_v34 = vpop.permute.xlu1 %1033 }
  0xef   : > { %vm1130_vm2 = vcmp.eq.s32.totalorder %v1034_v34, %v2027_v50 }
  0xf1   : > { %v1470_v37 = vpop.f32.mrb[0].mxu0  ;;  %v1031_v43 = vpop.permute.xlu0 %1030 }
  0xf2   : > { %v1494_v36 = vpop.f32.mrb[0].mxu1  ;;  %v2017_v41 = vpop.permute.xlu1 %1036  ;;  %v805_v42 = vmul.f32 2.0, %v1470_v37  ;;  %vm1129_vm3 = vcmp.eq.s32.totalorder %v1031_v43, %v2027_v50 }
  0xf3   : > { %v2015_v40 = vmul.f32 2.0, %v1494_v36  ;;  %v606_v44 = vpop.f32.mrb[1].mxu0  ;;  %v2019_v45 = vpop.f32.mrb[1].mxu1  ;;  %vm1131_vm4 = vcmp.eq.s32.totalorder %v2017_v41, %v2027_v50 }
  0xf4   : > { %v837_v48 = vsub.f32 %v773_v38, %v805_v42  ;;  %v804_v49 = vmul.f32 2.0, %v606_v44 }
  0xf5   : > { %v1473_v52 = vpop.f32.mrb[2].mxu0  ;;  %v2033_v58 = vpop.permute.xlu0 %1057 }
  0xf6   : > { %v1497_v51 = vpop.f32.mrb[2].mxu1  ;;  %v1162_v55 = vmax.f32 %v837_v48, 1e-12  ;;  %v836_v56 = vsub.f32 %v772_v46, %v804_v49  ;;  %v2031_v57 = vpop.permute.xlu1 %1039  ;;  %v807_v62 = vmul.f32 2.0, %v1473_v52  ;;  %vm1138_vm11 = vcmp.eq.s32.totalorder %v2033_v58, %v2027_v50 }
  0xf7   : > { %v2039_v61 = vmul.f32 2.0, %v1497_v51  ;;  %v616_v63 = vpop.f32.mrb[3].mxu0  ;;  %v2041_v0 = vpop.f32.mrb[3].mxu1  ;;  %vm1132_vm5 = vcmp.eq.s32.totalorder %v2031_v57, %v2027_v50 }
  0xf8   : > { %v1194_v2 = vmin.f32 %v1162_v55, 1e+12  ;;  %v1161_v4 = vmax.f32 %v836_v56, 1e-12  ;;  %v839_v7 = vsub.f32 %v775_v54, %v807_v62  ;;  %v806_v9 = vmul.f32 2.0, %v616_v63 }
  0xf9   : > { %v1476_v21 = vpop.f32.mrb[4].mxu0  ;;  %v2056_v55 = vpop.permute.xlu0 %1063  ;;  %v779_v56 = vadd.f32 %v2009_v35, %v1962_v11  ;;  %v776_v62 = vadd.f32 %v2009_v35, %v1958_v3 }
  0xfa   : > { %v1500_v19 = vpop.f32.mrb[4].mxu1  ;;  %v1226_v36 = vsel %vm1130_vm2, %v1194_v2, 0.0  ;;  %v1193_v37 = vmin.f32 %v1161_v4, 1e+12  ;;  %v1043_v42 = vpop.permute.xlu1 %1042  ;;  %v809_v23 = vmul.f32 2.0, %v1476_v21  ;;  %v838_v46 = vsub.f32 %v774_v53, %v806_v9 }
  0xfb   : > { %v2050_v38 = vmul.f32 2.0, %v1500_v19  ;;  %v1164_v44 = vmax.f32 %v839_v7, 1e-12  ;;  %v626_v34 = vpop.f32.mrb[5].mxu0  ;;  %v2052_v48 = vpop.f32.mrb[5].mxu1  ;;  %v2064_v4 = vadd.f32 %v2009_v35, %v1988_v25  ;;  %vm1133_vm6 = vcmp.eq.s32.totalorder %v1043_v42, %v2027_v50 }
  0xfc   : > { %v1225_v49 = vsel %vm1129_vm3, %v1193_v37, 0.0  ;;  %v841_v51 = vsub.f32 %v777_v59, %v809_v23  ;;  %v1163_v54 = vmax.f32 %v838_v46, 1e-12  ;;  %v808_v63 = vmul.f32 2.0, %v626_v34 }
  0xfd   : > { %v1257_v52 = vadd.f32 %v1226_v36, %v1225_v49  ;;  %v1196_v7 = vmin.f32 %v1164_v44, 1e+12  ;;  %v1479_v19 = vpop.f32.mrb[6].mxu0  ;;  %v778_v23 = vadd.f32 %v2009_v35, %v1960_v10  ;;  %v2082_v10 = vadd.f32 %v2009_v35, %v1992_v27  ;;  %v2084_v5 = vpop.permute.xlu0 %1069 }
  0xfe   : > { %v1503_v53 = vpop.f32.mrb[6].mxu1  ;;  %v1046_v2 = vpop.permute.xlu1 %1045  ;;  %v1195_v9 = vmin.f32 %v1163_v54, 1e+12  ;;  %v1166_v21 = vmax.f32 %v841_v51, 1e-12  ;;  %v840_v11 = vsub.f32 %v776_v62, %v808_v63  ;;  %v811_v36 = vmul.f32 2.0, %v1479_v19 }
  0xff   : > { %v2066_v59 = vmul.f32 2.0, %v1503_v53  ;;  %v636_v37 = vpop.f32.mrb[7].mxu0  ;;  %v2070_v3 = vpop.f32.mrb[7].mxu1  ;;  %v780_v63 = vadd.f32 %v2009_v35, %v1964_v6  ;;  %v1228_v53 = vsel %vm1132_vm5, %v1196_v7, 0.0  ;;  %vm1134_vm7 = vcmp.eq.s32.totalorder %v1046_v2, %v2027_v50 }
 0x100   : > { %v1227_v46 = vsel %vm1131_vm4, %v1195_v9, 0.0  ;;  %v1165_v41 = vmax.f32 %v840_v11, 1e-12  ;;  %v843_v51 = vsub.f32 %v779_v56, %v811_v36  ;;  %v810_v9 = vmul.f32 2.0, %v636_v37 }
 0x101   : > { %v1482_v34 = vpop.f32.mrb[8].mxu0  ;;  %v1258_v49 = vadd.f32 %v1257_v52, %v1227_v46  ;;  %v1198_v25 = vmin.f32 %v1166_v21, 1e+12  ;;  %v781_v56 = vadd.f32 %v2009_v35, %v1966_v12  ;;  %v2100_v42 = vadd.f32 %v2009_v35, %v1996_v29 }
 0x102   : > { %v1506_v44 = vpop.f32.mrb[8].mxu1  ;;  %v1049_v54 = vpop.permute.xlu1 %1048  ;;  %v1197_v19 = vmin.f32 %v1165_v41, 1e+12  ;;  %v842_v6 = vsub.f32 %v778_v23, %v810_v9  ;;  %v813_v11 = vmul.f32 2.0, %v1482_v34  ;;  %v1168_v37 = vmax.f32 %v843_v51, 1e-12 }
 0x103   : > { %v646_v62 = vpop.f32.mrb[9].mxu0  ;;  %v1259_v43 = vadd.f32 %v1258_v49, %v1228_v53  ;;  %v2086_v57 = vmul.f32 2.0, %v1506_v44  ;;  %v2088_v52 = vpop.f32.mrb[9].mxu1  ;;  %v1230_v23 = vsel %vm1134_vm7, %v1198_v25, 0.0  ;;  %vm1135_vm8 = vcmp.eq.s32.totalorder %v1049_v54, %v2027_v50 }
 0x104   : > { %v1229_v7 = vsel %vm1133_vm6, %v1197_v19, 0.0  ;;  %v812_v46 = vmul.f32 2.0, %v646_v62  ;;  %v1167_v53 = vmax.f32 %v842_v6, 1e-12  ;;  %v845_v47 = vsub.f32 %v781_v56, %v813_v11 }
 0x105   : > { %v1485_v36 = vpop.f32.mrb[10].mxu0  ;;  %v1260_v41 = vadd.f32 %v1259_v43, %v1229_v7  ;;  %v1200_v2 = vmin.f32 %v1168_v37, 1e+12  ;;  %v783_v29 = vadd.f32 %v2009_v35, %v1970_v13  ;;  %v782_v54 = vadd.f32 %v2009_v35, %v1968_v8 }
 0x106   : > { %v1509_v27 = vpop.f32.mrb[10].mxu1  ;;  %v1052_v49 = vpop.permute.xlu1 %1051  ;;  %v844_v34 = vsub.f32 %v780_v63, %v812_v46  ;;  %v1199_v19 = vmin.f32 %v1167_v53, 1e+12  ;;  %v815_v11 = vmul.f32 2.0, %v1485_v36  ;;  %v1170_v7 = vmax.f32 %v845_v47, 1e-12 }
 0x107   : > { %v656_v44 = vpop.f32.mrb[11].mxu0  ;;  %v2096_v12 = vpop.f32.mrb[11].mxu1  ;;  %v2102_v51 = vmul.f32 2.0, %v1509_v27  ;;  %v1261_v9 = vadd.f32 %v1260_v41, %v1230_v23  ;;  %vm1136_vm9 = vcmp.eq.s32.totalorder %v1052_v49, %v2027_v50  ;;  %v784_v13 = vadd.f32 %v2009_v35, %v1972_v14 }
 0x108   : > { %v1231_v25 = vsel %vm1135_vm8, %v1199_v19, 0.0  ;;  %v1169_v63 = vmax.f32 %v844_v34, 1e-12  ;;  %v2110_v46 = vpop.permute.xlu0 %1075  ;;  %v1232_v53 = vsel %vm1136_vm9, %v1200_v2, 0.0  ;;  %v847_v49 = vsub.f32 %v783_v29, %v815_v11 }
 0x109   : > { %2291 = vst [vmem:[#allocation5_spill] sm:$0xff] %v2102_v51  ;;  %v1488_v21 = vpop.f32.mrb[12].mxu0  ;;  %v1262_v27 = vadd.f32 %v1261_v9, %v1231_v25  ;;  %v814_v37 = vmul.f32 2.0, %v656_v44  ;;  %v2120_v36 = vadd.f32 %v2009_v35, %v1998_v30  ;;  %v785_v8 = vadd.f32 %v2009_v35, %v1974_v15 }
 0x10a   : > { %v1512_v62 = vpop.f32.mrb[12].mxu1  ;;  %v1055_v56 = vpop.permute.xlu1 %1054  ;;  %v1201_v44 = vmin.f32 %v1169_v63, 1e+12  ;;  %v1202_v25 = vmin.f32 %v1170_v7, 1e+12  ;;  %v817_v11 = vmul.f32 2.0, %v1488_v21  ;;  %v2137_v15 = vadd.f32 %v2009_v35, %v2002_v32 }
 0x10b   : > { %v666_v6 = vpop.f32.mrb[13].mxu0  ;;  %v2112_v41 = vpop.f32.mrb[13].mxu1  ;;  %2292 = vst [vmem:[#allocation6_spill] sm:$0xff] %v2120_v36  ;;  %v1263_v47 = vadd.f32 %v1262_v27, %v1232_v53  ;;  %v2122_v34 = vmul.f32 2.0, %v1512_v62  ;;  %v846_v2 = vsub.f32 %v782_v54, %v814_v37  ;;  %vm1137_vm10 = vcmp.eq.s32.totalorder %v1055_v56, %v2027_v50 }
 0x10c   : > { %v1172_v14 = vmax.f32 %v847_v49, 1e-12  ;;  %v787_v62 = vadd.f32 %v2009_v35, %v1978_v17  ;;  %v788_v27 = vadd.f32 %v2009_v35, %v1980_v18  ;;  %v820_v63 = vmul.f32 2.0, %v2019_v45  ;;  %v2142_v7 = vpop.permute.xlu0 %1081 }
 0x10d   : > { %v1491_v43 = vpop.f32.mrb[14].mxu0  ;;  %2293 = vst [vmem:[#allocation7_spill] sm:$0xff] %v2122_v34  ;;  %v1171_v56 = vmax.f32 %v846_v2, 1e-12  ;;  %v1233_v54 = vsel %vm1137_vm10, %v1201_v44, 0.0  ;;  %v849_v21 = vsub.f32 %v785_v8, %v817_v11  ;;  %v816_v17 = vmul.f32 2.0, %v666_v6 }
 0x10e   : > { %v1515_v23 = vpop.f32.mrb[14].mxu1  ;;  %v1061_v9 = vpop.permute.xlu1 %1060  ;;  %v1264_v49 = vadd.f32 %v1263_v47, %v1233_v54  ;;  %v1204_v18 = vmin.f32 %v1172_v14, 1e+12  ;;  %v1234_v30 = vsel %vm1138_vm11, %v1202_v25, 0.0  ;;  %v819_v2 = vmul.f32 2.0, %v1491_v43 }
 0x10f   : > { %v676_v19 = vpop.f32.mrb[15].mxu0  ;;  %v2127_v29 = vpop.f32.mrb[15].mxu1  ;;  %v2144_v37 = vmul.f32 2.0, %v1515_v23  ;;  %vm1139_vm12 = vcmp.eq.s32.totalorder %v1061_v9, %v2027_v50  ;;  %v1203_v32 = vmin.f32 %v1171_v56, 1e+12  ;;  %v848_v45 = vsub.f32 %v784_v13, %v816_v17 }
 0x110   : > { %v1174_v34 = vmax.f32 %v849_v21, 1e-12  ;;  %v1265_v36 = vadd.f32 %v1264_v49, %v1234_v30  ;;  %v851_v44 = vsub.f32 %v787_v62, %v819_v2  ;;  %v852_v11 = vsub.f32 %v788_v27, %v820_v63  ;;  %v2156_v13 = vpop.permute.xlu0 %1087 }
 0x111   : > { %v867_v58 = vsub.f32 %v2137_v15, %v2144_v37  ;;  %v1235_v51 = vsel %vm1139_vm12, %v1203_v32, 0.0  ;;  %v822_v6 = vmul.f32 2.0, %v2041_v0  ;;  %v1173_v23 = vmax.f32 %v848_v45, 1e-12 }
 0x112   : > { %v1067_v53 = vpop.permute.xlu1 %1066  ;;  %v1266_v47 = vadd.f32 %v1265_v36, %v1235_v51  ;;  %v786_v9 = vadd.f32 %v2009_v35, %v1976_v16  ;;  %v790_v43 = vadd.f32 %v2009_v35, %v1982_v20  ;;  %vm1140_vm13 = vcmp.eq.s32.totalorder %v2056_v55, %v2027_v50 }
 0x113   : > { %v818_v25 = vmul.f32 2.0, %v676_v19  ;;  %v1206_v14 = vmin.f32 %v1174_v34, 1e+12  ;;  %vm1141_vm14 = vcmp.eq.s32.totalorder %v1067_v53, %v2027_v50  ;;  %v1205_v30 = vmin.f32 %v1173_v23, 1e+12 }
 0x114   : > { %v1236_v62 = vsel %vm1140_vm13, %v1204_v18, 0.0  ;;  %v1176_v0 = vmax.f32 %v851_v44, 1e-12  ;;  %v1177_v56 = vmax.f32 %v852_v11, 1e-12  ;;  %v854_v16 = vsub.f32 %v790_v43, %v822_v6  ;;  %v1094_v53 = vpop.permute.xlu0 %1093 }
 0x115   : > { %v850_v27 = vsub.f32 %v786_v9, %v818_v25  ;;  %v1267_v51 = vadd.f32 %v1266_v47, %v1236_v62  ;;  %v1237_v63 = vsel %vm1141_vm14, %v1205_v30, 0.0  ;;  %v824_v20 = vmul.f32 2.0, %v2052_v48 }
 0x116   : > { %v1073_v8 = vpop.permute.xlu1 %1072  ;;  %vm1142_vm15 = vcmp.eq.s32.totalorder %v2084_v5, %v2027_v50  ;;  %v792_v19 = vadd.f32 %v2009_v35, %v1984_v22  ;;  %v1208_v21 = vmin.f32 %v1176_v0, 1e+12  ;;  %v2294_v32 = vsub.f32 %v2013_v39, %v2015_v40 }
 0x117   : > { %v1175_v55 = vmax.f32 %v850_v27, 1e-12  ;;  %v1268_v54 = vadd.f32 %v1267_v51, %v1237_v63  ;;  %vm1143_vm0 = vcmp.eq.s32.totalorder %v1073_v8, %v2027_v50  ;;  %v1238_v34 = vsel %vm1142_vm15, %v1206_v14, 0.0 }
 0x118   : > { %v1178_v48 = vmax.f32 %v2294_v32, 1e-12  ;;  %v1179_v2 = vmax.f32 %v854_v16, 1e-12  ;;  %v856_v5 = vsub.f32 %v792_v19, %v824_v20  ;;  %v826_v45 = vmul.f32 2.0, %v2070_v3  ;;  %v1100_v14 = vpop.permute.xlu0 %1099 }
 0x119   : > { %v1207_v49 = vmin.f32 %v1175_v55, 1e+12  ;;  %v1269_v17 = vadd.f32 %v1268_v54, %v1238_v34  ;;  %v1209_v8 = vmin.f32 %v1177_v56, 1e+12  ;;  %v794_v22 = vadd.f32 %v2009_v35, %v1986_v24 }
 0x11a   : > { %v1079_v36 = vpop.permute.xlu1 %1078  ;;  %vm1144_vm2 = vcmp.eq.s32.totalorder %v2110_v46, %v2027_v50  ;;  %v796_v6 = vadd.f32 %v2009_v35, %v1990_v26  ;;  %v828_v39 = vmul.f32 2.0, %v2088_v52  ;;  %v2295_v3 = vsub.f32 %v2037_v60, %v2039_v61 }
 0x11b   : > { %vm1145_vm1 = vcmp.eq.s32.totalorder %v1079_v36, %v2027_v50  ;;  %v1239_v44 = vsel %vm1143_vm0, %v1207_v49, 0.0  ;;  %v1240_v40 = vsel %vm1144_vm2, %v1208_v21, 0.0  ;;  %vm1146_vm3 = vcmp.eq.s32.totalorder %v2142_v7, %v2027_v50 }
 0x11c   : > { %v1270_v11 = vadd.f32 %v1269_v17, %v1239_v44  ;;  %v1241_v23 = vsel %vm1145_vm1, %v1209_v8, 0.0  ;;  %v1180_v9 = vmax.f32 %v2295_v3, 1e-12  ;;  %v1181_v46 = vmax.f32 %v856_v5, 1e-12 }
 0x11d   : > { %v858_v43 = vsub.f32 %v794_v22, %v826_v45  ;;  %v1210_v25 = vmin.f32 %v1178_v48, 1e+12  ;;  %v1211_v26 = vmin.f32 %v1179_v2, 1e+12  ;;  %v2296_v52 = vsub.f32 %v2044_v1, %v2050_v38 }
 0x11e   : > { %v1085_v18 = vpop.permute.xlu1 %1084  ;;  %v1271_v24 = vadd.f32 %v1270_v11, %v1240_v40  ;;  %v860_v0 = vsub.f32 %v796_v6, %v828_v39  ;;  %v830_v51 = vmul.f32 2.0, %v2096_v12  ;;  %vm1148_vm5 = vcmp.eq.s32.totalorder %v2156_v13, %v2027_v50  ;;  %v1106_v12 = vpop.permute.xlu0 %1105  ;;  %v2299_v40 = vld [vmem:[#allocation5_spill] sm:$0xff] }
 0x11f   : > { %vm1147_vm4 = vcmp.eq.s32.totalorder %v1085_v18, %v2027_v50  ;;  %v1182_v62 = vmax.f32 %v2296_v52, 1e-12  ;;  %v1242_v27 = vsel %vm1146_vm3, %v1210_v25, 0.0  ;;  %v1183_v36 = vmax.f32 %v858_v43, 1e-12 }
 0x120   : > { %v1272_v30 = vadd.f32 %v1271_v24, %v1241_v23  ;;  %v1243_v60 = vsel %vm1147_vm4, %v1211_v26, 0.0  ;;  %v1212_v56 = vmin.f32 %v1180_v9, 1e+12  ;;  %v1213_v16 = vmin.f32 %v1181_v46, 1e+12  ;;  %v2302_v26 = vld [vmem:[#allocation7_spill] sm:$0xff] }
 0x121   : > { %v798_v63 = vadd.f32 %v2009_v35, %v1994_v28  ;;  %v2297_v38 = vsub.f32 %v2064_v4, %v2066_v59  ;;  %v1185_v55 = vmax.f32 %v860_v0, 1e-12  ;;  %vm1150_vm7 = vcmp.eq.s32.totalorder %v1094_v53, %v2027_v50 }
 0x122   : > { %v1091_v47 = vpop.permute.xlu1 %1090  ;;  %v1273_v7 = vadd.f32 %v1272_v30, %v1242_v27  ;;  %v1244_v54 = vsel %vm1148_vm5, %v1212_v56, 0.0  ;;  %v832_v49 = vmul.f32 2.0, %v2112_v41  ;;  %v1214_v17 = vmin.f32 %v1182_v62, 1e+12  ;;  %v1112_v22 = vpop.permute.xlu0 %1111 }
 0x123   : > { %vm1149_vm6 = vcmp.eq.s32.totalorder %v1091_v47, %v2027_v50  ;;  %v1184_v20 = vmax.f32 %v2297_v38, 1e-12  ;;  %v862_v13 = vsub.f32 %v798_v63, %v830_v51  ;;  %v1215_v28 = vmin.f32 %v1183_v36, 1e+12 }
 0x124   : > { %v1274_v1 = vadd.f32 %v1273_v7, %v1243_v60  ;;  %v1245_v34 = vsel %vm1149_vm6, %v1213_v16, 0.0  ;;  %v800_v4 = vadd.f32 %v2009_v35, %v2000_v31  ;;  %v2298_v59 = vsub.f32 %v2082_v10, %v2086_v57 }
 0x125   : > { %v1246_v48 = vsel %vm1150_vm7, %v1214_v17, 0.0  ;;  %v1187_v45 = vmax.f32 %v862_v13, 1e-12  ;;  %vm1152_vm9 = vcmp.eq.s32.totalorder %v1100_v14, %v2027_v50  ;;  %v834_v44 = vmul.f32 2.0, %v2127_v29  ;;  %v2301_v14 = vld [vmem:[#allocation6_spill] sm:$0xff] }
 0x126   : > { %v1097_v61 = vpop.permute.xlu1 %1096  ;;  %v1275_v21 = vadd.f32 %v1274_v1, %v1244_v54  ;;  %v1186_v32 = vmax.f32 %v2298_v59, 1e-12  ;;  %v864_v41 = vsub.f32 %v800_v4, %v832_v49  ;;  %v1216_v8 = vmin.f32 %v1184_v20, 1e+12 }
 0x127   : > { %vm1151_vm8 = vcmp.eq.s32.totalorder %v1097_v61, %v2027_v50  ;;  %v1217_v11 = vmin.f32 %v1185_v55, 1e+12  ;;  %v802_v10 = vadd.f32 %v2009_v35, %v2004_v33  ;;  %v2300_v23 = vsub.f32 %v2100_v42, %v2299_v40  ;;  %v1118_v33 = vpop.permute.xlu0 %1117 }
 0x128   : > { %v1276_v18 = vadd.f32 %v1275_v21, %v1245_v34  ;;  %v1247_v2 = vsel %vm1151_vm8, %v1215_v28, 0.0  ;;  %v1248_v57 = vsel %vm1152_vm9, %v1216_v8, 0.0  ;;  %vm1154_vm11 = vcmp.eq.s32.totalorder %v1106_v12, %v2027_v50 }
 0x129   : > { %v1188_v47 = vmax.f32 %v2300_v23, 1e-12  ;;  %v1189_v29 = vmax.f32 %v864_v41, 1e-12  ;;  %v866_v9 = vsub.f32 %v802_v10, %v834_v44  ;;  %v1218_v24 = vmin.f32 %v1186_v32, 1e+12 }
 0x12a   : > { %v1103_v19 = vpop.permute.xlu1 %1102  ;;  %v1277_v53 = vadd.f32 %v1276_v18, %v1246_v48  ;;  %v1219_v46 = vmin.f32 %v1187_v45, 1e+12  ;;  %v2303_v30 = vsub.f32 %v2301_v14, %v2302_v26  ;;  %vm1156_vm13 = vcmp.eq.s32.totalorder %v1112_v22, %v2027_v50 }
 0x12b   : > { %vm1153_vm10 = vcmp.eq.s32.totalorder %v1103_v19, %v2027_v50  ;;  %v1250_v25 = vsel %vm1154_vm11, %v1218_v24, 0.0  ;;  %v1191_v62 = vmax.f32 %v866_v9, 1e-12  ;;  %v1220_v0 = vmin.f32 %v1188_v47, 1e+12  ;;  %v1124_v1 = vpop.permute.xlu0 %1123 }
 0x12c   : > { %v1278_v31 = vadd.f32 %v1277_v53, %v1247_v2  ;;  %v1249_v6 = vsel %vm1153_vm10, %v1217_v11, 0.0  ;;  %v1190_v42 = vmax.f32 %v2303_v30, 1e-12  ;;  %v1221_v27 = vmin.f32 %v1189_v29, 1e+12 }
 0x12d   : > { %v1252_v51 = vsel %vm1156_vm13, %v1220_v0, 0.0  ;;  %vm1158_vm15 = vcmp.eq.s32.totalorder %v1118_v33, %v2027_v50  ;;  %v1192_v56 = vmax.f32 %v867_v58, 1e-12  ;;  %v1223_v16 = vmin.f32 %v1191_v62, 1e+12 }
 0x12e   : > { %v1109_v5 = vpop.permute.xlu1 %1108  ;;  %v1279_v3 = vadd.f32 %v1278_v31, %v1248_v57  ;;  %v1222_v63 = vmin.f32 %v1190_v42, 1e+12  ;;  %vm1160_vm1 = vcmp.eq.s32.totalorder %v1124_v1, %v2027_v50 }
 0x12f   : > { %vm1155_vm12 = vcmp.eq.s32.totalorder %v1109_v5, %v2027_v50  ;;  %v1224_v12 = vmin.f32 %v1192_v56, 1e+12 }
 0x130   : > { %v1280_v43 = vadd.f32 %v1279_v3, %v1249_v6  ;;  %v1251_v35 = vsel %vm1155_vm12, %v1219_v46, 0.0  ;;  %v1254_v20 = vsel %vm1158_vm15, %v1222_v63, 0.0 }
 0x131   : > { %v1256_v19 = vsel %vm1160_vm1, %v1224_v12, 0.0 }
 0x132   : > { %v1115_v39 = vpop.permute.xlu1 %1114  ;;  %v1281_v52 = vadd.f32 %v1280_v43, %v1250_v25 }
 0x133   : > { %vm1157_vm14 = vcmp.eq.s32.totalorder %v1115_v39, %v2027_v50 }
 0x134   : > { %v1282_v61 = vadd.f32 %v1281_v52, %v1251_v35  ;;  %v1253_v7 = vsel %vm1157_vm14, %v1221_v27, 0.0 }
 0x136   : > { %v1121_v60 = vpop.permute.xlu1 %1120  ;;  %v1283_v36 = vadd.f32 %v1282_v61, %v1252_v51 }
 0x137   : > { %vm1159_vm0 = vcmp.eq.s32.totalorder %v1121_v60, %v2027_v50 }
 0x138   : > { %v1284_v38 = vadd.f32 %v1283_v36, %v1253_v7  ;;  %v1255_v55 = vsel %vm1159_vm0, %v1223_v16, 0.0 }
 0x13a   : > { %v1285_v54 = vadd.f32 %v1284_v38, %v1254_v20 }
 0x13c   : > { %v1286_v34 = vadd.f32 %v1285_v54, %v1255_v55 }
 0x13e   : > { %v1287_v13 = vadd.f32 %v1286_v34, %v1256_v19 }
 0x140   : > { %1290 = vst [vmem:[%s256_s9] sm:$0xff] %v1287_v13 }
 0x141   : > { %1590 = shalt.err (!%p1587_p5)
}
 0x142   : > { %s1591_s24 = scalar_lea.hbm %s2231_s13, 128  ;;  %s1595_s29 = scalar_lea.hbm %s2285_s5, 256 }
 0x143   : > { %p1592_p6 = scmp.ne.s32.totalorder %s2231_s13, %s1591_s24  ;;  %p1596_p10 = scmp.lt.u32.totalorder %s2231_s13, %s2285_s5 }
 0x144   : > { %p1597_p11 = scmp.lt.u32.totalorder %s1595_s29, %s1591_s24  ;;  %p1599_p13 = scmp.lt.u32.totalorder %s1591_s24, %s2231_s13 }
 0x145   : > { %p1593_p7 = pnand %p1592_p6, %p1729_p4 }
 0x146   : > { %p1598_p12 = por %p1597_p11, %p1596_p10 }
 0x147   : > { %p1594_p9 = pneg %p1593_p7 }
 0x148   : > { %p1600_p0 = por %p1599_p13, %p1598_p12 }
 0x14a   : > { %p1601_p1 = pnand %p1600_p0, %p1594_p9 }
 0x14c   : > { %1604 = shalt.err (!%p1601_p1)
}
 0x14d   : > { %1518 = dma.vmem_to_hbm [thread:$0]  (%p1729_p4), %s2233_s10, 128, %s2231_s13, %s1292_s14  }
 0x14e PF: > { %p1524_p2 = scmp.ge.s32.totalorder %s1655_s23, 2  ;;  %s1317_s9 = sand.u32 1, %s1635_s18  }
 0x14f   : > { %s1318_s11 = scalar_lea.sflag [#allocation3], %s1317_s9 }
 0x150   : > { %p1521_p3 = pnand %p1524_p2, %p1736_p8 }
 0x152   : > { %1630 = dma.done.wait (!%p1521_p3), %s1318_s11, 128  }
 0x153   : > { %1632 = vsyncadd (!%p1521_p3), %s1318_s11, 4294967168  ;;  %s18_s23 = sadd.s32 1, %s1655_s23   ;;  %s2304_s18 = smov %s1639_s19 }
 0x154   : > { %p15_p5 = scmp.ge.s32.totalorder %s18_s23, 4   ;;  %s2305_s19 = smov %s1643_s20 }
 0x155   : > { %s2306_s20 = smov %s1742_s6  ;;  %s2307_s21 = smov %s1651_s22 }
 0x156   : > { %s2308_s22 = smov %s2310_s26  ;;  %17 = sbr.rel (!%p15_p5) target bundleno = 4 (0x4), region = 82 }
 0x15d   :  { %1323 = vsyncpa [#allocation3], 1 }
 0x15e   :  { %1325 = vsyncpa [#allocation3 + $0x1], 1 }

</bundles_post_ra>
